<compile_context>
chip_gen: v6e
topology: v6e:2x2x1
jax: 0.10.0
libtpu: 0.0.40
codegen_flags: <defaults>
</compile_context>

<pallas_src>
import jax
import jax.numpy as jnp
from jax.experimental import pallas as pl
from jax.experimental.pallas import tpu as pltpu


def _layernorm(h, gamma, beta, eps=1e-5):
    mu = jnp.mean(h, axis=-1, keepdims=True)
    var = jnp.mean(jnp.square(h - mu), axis=-1, keepdims=True)
    return (h - mu) * jax.lax.rsqrt(var + eps) * gamma + beta


def node_model_kernel(
    # data
    x_ref, ea_ref, u_ref, idx_ref,
    # packed parameters
    wx_ref,     # [H, 2*HID]             bf16  ([w1x | w2x], fused x-projection)
    w_ref,      # [H+2*HID+2*H+2*HID, HID] bf16 (w1e,w11,w12,w2a,w2u,w21,w22)
    wout_ref,   # [HID, 2*H]             bf16  ([w13 | w23], side-by-side)
    vec_ref,    # [12, HID]              f32   (biases + LN params, b3 rows padded)
    # output (HBM-aliased with x)
    out_ref,
):
    f32 = jnp.float32
    bf16 = jnp.bfloat16
    dot = lambda a, b: jnp.dot(a, b, preferred_element_type=f32)

    N, H = x_ref.shape
    E = ea_ref.shape[0]
    B = u_ref.shape[0]
    HID = w_ref.shape[1]
    L = idx_ref.shape[0] - 1      # rows 0..L-1: [row | batch] columns, row L: col

    x = x_ref[...].astype(f32)            # [N, H] (kept f32 for the residual)
    x_b = x.astype(bf16)
    ea_b = ea_ref[...].astype(bf16)       # [E, H]
    u_b = u_ref[...].astype(bf16)         # [B, H]

    # ---- unpack the single packed index slab (static slices) ---------------
    row = idx_ref[0:E, 0:1]               # [E, 1] int32
    bat = idx_ref[0:N, 1:2]               # [N, 1] int32
    col = idx_ref[L:L + 1, 0:E]           # [1, E] int32

    # ---- unpack bias / LayerNorm slab (stays f32; never touches the MXU) ---
    vec = vec_ref[...]
    b10, b11, b12 = vec[0:1, :], vec[1:2, :], vec[2:3, :]
    g1, be1 = vec[3:4, :], vec[4:5, :]
    b20, b21, b22 = vec[5:6, :], vec[6:7, :], vec[7:8, :]
    g2, be2 = vec[8:9, :], vec[9:10, :]
    b13 = vec[10:11, :H]
    b23 = vec[11:12, :H]

    # ---- unpack hidden-weight slab with static (tile-aligned) row offsets --
    w1e = w_ref[0:H, :]
    w11 = w_ref[H:H + HID, :]
    w12 = w_ref[H + HID:H + 2 * HID, :]
    o2 = H + 2 * HID
    w2a = w_ref[o2:o2 + H, :]
    w2u = w_ref[o2 + H:o2 + 2 * H, :]
    w21 = w_ref[o2 + 2 * H:o2 + 2 * H + HID, :]
    w22 = w_ref[o2 + 2 * H + HID:o2 + 2 * H + 2 * HID, :]

    # ---- one-hot selection matrices (0/1: exact in bf16) -------------------
    row_oh = (jax.lax.broadcasted_iota(jnp.int32, (E, N), 1) == row).astype(bf16)  # [E, N]
    col_oh = (jax.lax.broadcasted_iota(jnp.int32, (N, E), 0) == col).astype(bf16)  # [N, E]
    bat_oh = (jax.lax.broadcasted_iota(jnp.int32, (N, B), 1) == bat).astype(bf16)  # [N, B]

    # ---- fused x-projection for both MLPs (one 128-wide matmul) ------------
    xp_both = dot(x_b, wx_ref[...])                                # [N, 2*HID] f32
    xp1 = xp_both[:, :HID]                                         # x @ w1x
    xp2 = xp_both[:, HID:]                                         # x @ w2x

    # ---- MLP1 on cat([x[row], edge_attr]): project over N rows, then gather
    h = dot(row_oh, xp1.astype(bf16)) + dot(ea_b, w1e) + b10       # [E, HID]
    h = jnp.maximum(h, 0.0)
    h = jnp.maximum(dot(h.astype(bf16), w11) + b11, 0.0)
    h = jnp.maximum(dot(h.astype(bf16), w12) + b12, 0.0)
    h = _layernorm(h, g1, be1)
    mm1 = dot(h.astype(bf16), wout_ref[...])                       # [E, 2H]
    m1 = mm1[:, :H] + b13                                          # h @ w13 + b13

    # ---- scatter_sum(m1, col, dim_size=N) via one-hot matmul ---------------
    agg = dot(col_oh, m1.astype(bf16))                             # [N, H]

    # ---- MLP2 on cat([x, agg, u[batch]]): project u over B rows, then expand
    up = dot(u_b, w2u)                                             # [B, HID]
    h2 = (xp2
          + dot(agg.astype(bf16), w2a)
          + dot(bat_oh, up.astype(bf16))                           # [N, HID]
          + b20)
    h2 = jnp.maximum(h2, 0.0)
    h2 = jnp.maximum(dot(h2.astype(bf16), w21) + b21, 0.0)
    h2 = jnp.maximum(dot(h2.astype(bf16), w22) + b22, 0.0)
    h2 = _layernorm(h2, g2, be2)
    mm2 = dot(h2.astype(bf16), wout_ref[...])                      # [N, 2H]
    m2 = mm2[:, H:] + b23                                          # h2 @ w23 + b23

    out_ref[...] = (x + m2).astype(out_ref.dtype)


def make_mlp_params(key, n_in_parts, n_out, hidden=64):
    """Deterministic params for MLP(n_in, n_out) with the first Linear split
    into one weight block per concatenated input part."""
    keys = jax.random.split(key, 16)
    scale = 0.1
    params = []
    for i, n_in in enumerate(n_in_parts):                                      # W0 blocks
        params.append(scale * jax.random.normal(keys[i], (n_in, hidden), jnp.float32))
    params.append(scale * jax.random.normal(keys[4], (1, hidden), jnp.float32))       # b0
    params.append(scale * jax.random.normal(keys[5], (hidden, hidden), jnp.float32))  # W1
    params.append(scale * jax.random.normal(keys[6], (1, hidden), jnp.float32))       # b1
    params.append(scale * jax.random.normal(keys[7], (hidden, hidden), jnp.float32))  # W2
    params.append(scale * jax.random.normal(keys[8], (1, hidden), jnp.float32))       # b2
    params.append(1.0 + 0.1 * jax.random.normal(keys[9], (1, hidden), jnp.float32))   # LN gamma
    params.append(0.1 * jax.random.normal(keys[10], (1, hidden), jnp.float32))        # LN beta
    params.append(scale * jax.random.normal(keys[11], (hidden, n_out), jnp.float32))  # W3
    params.append(scale * jax.random.normal(keys[12], (1, n_out), jnp.float32))       # b3
    return params


def pack_params(p1, p2, hidden=64):
    """Pack the 23 small parameter arrays into 4 slabs (done once, off the hot
    path).  Weight slabs are pre-cast to bf16 (native MXU input dtype)."""
    (w1x, w1e, b10, w11, b11, w12, b12, g1, be1, w13, b13) = p1
    (w2x, w2a, w2u, b20, w21, b21, w22, b22, g2, be2, w23, b23) = p2

    # Fused x-projection weights, column-wise -> [H, 2*hidden] (128-lane dense).
    wx_slab = jnp.concatenate([w1x, w2x], axis=1).astype(jnp.bfloat16)
    # Remaining hidden-output weights, row-stacked -> [*, hidden].
    w_slab = jnp.concatenate(
        [w1e, w11, w12, w2a, w2u, w21, w22], axis=0).astype(jnp.bfloat16)
    # Output weights side-by-side -> [hidden, 2*H] (lane-dense, no 32-wide dim).
    wout_slab = jnp.concatenate([w13, w23], axis=1).astype(jnp.bfloat16)

    def pad(v):  # [1, H] -> [1, hidden]
        return jnp.pad(v, ((0, 0), (0, hidden - v.shape[1])))

    vec_slab = jnp.concatenate(
        [b10, b11, b12, g1, be1, b20, b21, b22, g2, be2, pad(b13), pad(b23)],
        axis=0).astype(jnp.float32)
    return wx_slab, w_slab, wout_slab, vec_slab


def _node_model_forward(x, edge_index, edge_attr, u, batch,
                        wx_slab, w_slab, wout_slab, vec_slab):
    N, H = x.shape
    E = edge_attr.shape[0]

    # Pack row / col / batch into ONE int32 slab (single DMA descriptor):
    #   rows 0..L-1, col 0 : row indices   (length E, column-oriented)
    #   rows 0..L-1, col 1 : batch indices (length N, column-oriented)
    #   row  L,      :E    : col indices   (row-oriented, as the scatter needs)
    L = max(E, N)
    W = max(E, 2)
    row_i = edge_index[0].astype(jnp.int32)
    col_i = edge_index[1].astype(jnp.int32)
    bat_i = batch.astype(jnp.int32)
    idx = jnp.zeros((L + 1, W), jnp.int32)
    idx = idx.at[:E, 0:1].set(row_i.reshape(E, 1))
    idx = idx.at[:N, 1:2].set(bat_i.reshape(N, 1))
    idx = idx.at[L:L + 1, :E].set(col_i.reshape(1, E))

    inputs = (x, edge_attr, u, idx, wx_slab, w_slab, wout_slab, vec_slab)
    vmem = pl.BlockSpec(memory_space=pltpu.MemorySpace.VMEM)
    return pl.pallas_call(
        node_model_kernel,
        out_shape=jax.ShapeDtypeStruct((N, H), x.dtype),
        in_specs=[vmem] * len(inputs),
        out_specs=vmem,
        # out has identical shape/dtype to x and x is fully read before the
        # final store: reuse x's HBM buffer for the output.
        input_output_aliases={0: 0},
    )(*inputs)


# Donate x at the jit boundary so the pallas-level alias is realized in HBM
# (no defensive copy inserted by XLA).
node_model_forward = jax.jit(_node_model_forward, donate_argnums=(0,))


# ------------------------- pure-JAX (f32) reference --------------------------
def _mlp_ref(inp_parts, params):
    ws_in = params[: len(inp_parts)]
    (b0, w1, b1, w2, b2, g, be, w3, b3) = params[len(inp_parts):]
    h = sum(p @ w for p, w in zip(inp_parts, ws_in)) + b0
    h = jnp.maximum(h, 0.0)
    h = jnp.maximum(h @ w1 + b1, 0.0)
    h = jnp.maximum(h @ w2 + b2, 0.0)
    h = _layernorm(h, g, be)
    return h @ w3 + b3


def node_model_ref(x, edge_index, edge_attr, u, batch, p1, p2):
    row, col = edge_index[0], edge_index[1]
    m1 = _mlp_ref([x[row], edge_attr], p1)
    agg = jnp.zeros_like(x).at[col].add(m1)
    m2 = _mlp_ref([x, agg, u[batch]], p2)
    return x + m2


if __name__ == "__main__":
    key = jax.random.PRNGKey(0)
    kx, ke, ku, kr, kc, kb, kp1, kp2 = jax.random.split(key, 8)

    H = 32      # node / edge / global feature width ("hidden" of NodeModel)
    N = 8       # number of nodes
    E = 16      # number of edges
    B = 2       # number of graphs in the batch
    HID = 64    # MLP internal width

    x = jax.random.normal(kx, (N, H), jnp.float32)
    edge_attr = jax.random.normal(ke, (E, H), jnp.float32)
    u = jax.random.normal(ku, (B, H), jnp.float32)
    row = jax.random.randint(kr, (E,), 0, N, jnp.int32)
    col = jax.random.randint(kc, (E,), 0, N, jnp.int32)
    edge_index = jnp.stack([row, col], axis=0)
    batch = jnp.sort(jax.random.randint(kb, (N,), 0, B, jnp.int32))

    p1 = make_mlp_params(kp1, n_in_parts=(H, H), n_out=H, hidden=HID)      # node_mlp_1: 2H -> H
    p2 = make_mlp_params(kp2, n_in_parts=(H, H, H), n_out=H, hidden=HID)   # node_mlp_2: 3H -> H

    # Pack parameters once, outside the jitted hot path.
    wx_slab, w_slab, wout_slab, vec_slab = pack_params(p1, p2, hidden=HID)

    # Reference is pure f32; the kernel feeds the MXU bf16 inputs (f32 accum),
    # so the comparison tolerance is loosened accordingly.  Computed BEFORE the
    # kernel call because x is donated to (aliased with) the kernel output.
    ref = node_model_ref(x, edge_index, edge_attr, u, batch, p1, p2)
    ref = jax.block_until_ready(ref)

    out = node_model_forward(x, edge_index, edge_attr, u, batch,
                             wx_slab, w_slab, wout_slab, vec_slab)
    out = jax.block_until_ready(out)
    assert out.shape == (N, H)

    err = float(jnp.max(jnp.abs(out - ref)))
    scale = float(jnp.max(jnp.abs(ref)))
    assert err < 5e-2 * scale, f"mismatch vs. pure-JAX reference: max_abs_err={err}, scale={scale}"

    print("KERNEL_OK")
</pallas_src>

<mosaic_0001>
module attributes {stable_mosaic.version = 11 : i64} {
  func.func @node_model_kernel(%arg0: memref<8x32xf32, #tpu.memory_space<vmem>>, %arg1: memref<16x32xf32, #tpu.memory_space<vmem>>, %arg2: memref<2x32xf32, #tpu.memory_space<vmem>>, %arg3: memref<17x16xi32, #tpu.memory_space<vmem>>, %arg4: memref<32x128xbf16, #tpu.memory_space<vmem>>, %arg5: memref<352x64xbf16, #tpu.memory_space<vmem>>, %arg6: memref<64x64xbf16, #tpu.memory_space<vmem>>, %arg7: memref<12x64xf32, #tpu.memory_space<vmem>>, %arg8: memref<8x32xf32, #tpu.memory_space<vmem>>) attributes {dimension_semantics = [], scalar_prefetch = 0 : i64, scratch_operands = 0 : i64, tpu.core_type = #tpu.core_type<tc>} {
    %c0 = arith.constant 0 : index
    %c0_0 = arith.constant 0 : index
    %0 = vector.load %arg0[%c0, %c0_0] : memref<8x32xf32, #tpu.memory_space<vmem>>, vector<8x32xf32>
    %1 = arith.truncf %0 : vector<8x32xf32> to vector<8x32xbf16>
    %c0_1 = arith.constant 0 : index
    %c0_2 = arith.constant 0 : index
    %2 = vector.load %arg1[%c0_1, %c0_2] : memref<16x32xf32, #tpu.memory_space<vmem>>, vector<16x32xf32>
    %3 = arith.truncf %2 : vector<16x32xf32> to vector<16x32xbf16>
    %c0_3 = arith.constant 0 : index
    %c0_4 = arith.constant 0 : index
    %4 = vector.load %arg2[%c0_3, %c0_4] : memref<2x32xf32, #tpu.memory_space<vmem>>, vector<2x32xf32>
    %5 = arith.truncf %4 : vector<2x32xf32> to vector<2x32xbf16>
    %c0_5 = arith.constant 0 : index
    %c0_6 = arith.constant 0 : index
    %6 = vector.load %arg3[%c0_5, %c0_6] : memref<17x16xi32, #tpu.memory_space<vmem>>, vector<16x1xi32>
    %c0_7 = arith.constant 0 : index
    %c1 = arith.constant 1 : index
    %7 = vector.load %arg3[%c0_7, %c1] : memref<17x16xi32, #tpu.memory_space<vmem>>, vector<8x1xi32>
    %c16 = arith.constant 16 : index
    %c0_8 = arith.constant 0 : index
    %8 = vector.load %arg3[%c16, %c0_8] : memref<17x16xi32, #tpu.memory_space<vmem>>, vector<1x16xi32>
    %c0_9 = arith.constant 0 : index
    %c0_10 = arith.constant 0 : index
    %9 = vector.load %arg7[%c0_9, %c0_10] : memref<12x64xf32, #tpu.memory_space<vmem>>, vector<12x64xf32>
    %10 = vector.extract_strided_slice %9 {offsets = [0, 0], sizes = [1, 64], strides = [1, 1]} : vector<12x64xf32> to vector<1x64xf32>
    %11 = vector.extract_strided_slice %9 {offsets = [1, 0], sizes = [1, 64], strides = [1, 1]} : vector<12x64xf32> to vector<1x64xf32>
    %12 = vector.extract_strided_slice %9 {offsets = [2, 0], sizes = [1, 64], strides = [1, 1]} : vector<12x64xf32> to vector<1x64xf32>
    %13 = vector.extract_strided_slice %9 {offsets = [3, 0], sizes = [1, 64], strides = [1, 1]} : vector<12x64xf32> to vector<1x64xf32>
    %14 = vector.extract_strided_slice %9 {offsets = [4, 0], sizes = [1, 64], strides = [1, 1]} : vector<12x64xf32> to vector<1x64xf32>
    %15 = vector.extract_strided_slice %9 {offsets = [5, 0], sizes = [1, 64], strides = [1, 1]} : vector<12x64xf32> to vector<1x64xf32>
    %16 = vector.extract_strided_slice %9 {offsets = [6, 0], sizes = [1, 64], strides = [1, 1]} : vector<12x64xf32> to vector<1x64xf32>
    %17 = vector.extract_strided_slice %9 {offsets = [7, 0], sizes = [1, 64], strides = [1, 1]} : vector<12x64xf32> to vector<1x64xf32>
    %18 = vector.extract_strided_slice %9 {offsets = [8, 0], sizes = [1, 64], strides = [1, 1]} : vector<12x64xf32> to vector<1x64xf32>
    %19 = vector.extract_strided_slice %9 {offsets = [9, 0], sizes = [1, 64], strides = [1, 1]} : vector<12x64xf32> to vector<1x64xf32>
    %20 = vector.extract_strided_slice %9 {offsets = [10, 0], sizes = [1, 32], strides = [1, 1]} : vector<12x64xf32> to vector<1x32xf32>
    %21 = vector.extract_strided_slice %9 {offsets = [11, 0], sizes = [1, 32], strides = [1, 1]} : vector<12x64xf32> to vector<1x32xf32>
    %c0_11 = arith.constant 0 : index
    %c0_12 = arith.constant 0 : index
    %22 = vector.load %arg5[%c0_11, %c0_12] : memref<352x64xbf16, #tpu.memory_space<vmem>>, vector<32x64xbf16>
    %c32 = arith.constant 32 : index
    %c0_13 = arith.constant 0 : index
    %23 = vector.load %arg5[%c32, %c0_13] : memref<352x64xbf16, #tpu.memory_space<vmem>>, vector<64x64xbf16>
    %c96 = arith.constant 96 : index
    %c0_14 = arith.constant 0 : index
    %24 = vector.load %arg5[%c96, %c0_14] : memref<352x64xbf16, #tpu.memory_space<vmem>>, vector<64x64xbf16>
    %c160 = arith.constant 160 : index
    %c0_15 = arith.constant 0 : index
    %25 = vector.load %arg5[%c160, %c0_15] : memref<352x64xbf16, #tpu.memory_space<vmem>>, vector<32x64xbf16>
    %c192 = arith.constant 192 : index
    %c0_16 = arith.constant 0 : index
    %26 = vector.load %arg5[%c192, %c0_16] : memref<352x64xbf16, #tpu.memory_space<vmem>>, vector<32x64xbf16>
    %c224 = arith.constant 224 : index
    %c0_17 = arith.constant 0 : index
    %27 = vector.load %arg5[%c224, %c0_17] : memref<352x64xbf16, #tpu.memory_space<vmem>>, vector<64x64xbf16>
    %c288 = arith.constant 288 : index
    %c0_18 = arith.constant 0 : index
    %28 = vector.load %arg5[%c288, %c0_18] : memref<352x64xbf16, #tpu.memory_space<vmem>>, vector<64x64xbf16>
    %29 = tpu.iota {dimensions = array<i32: 1>} : vector<16x8xi32>
    %30 = vector.broadcast %6 : vector<16x1xi32> to vector<16x8xi32>
    %31 = arith.cmpi eq, %29, %30 : vector<16x8xi32>
    %32 = arith.extui %31 : vector<16x8xi1> to vector<16x8xi32>
    %33 = arith.sitofp %32 : vector<16x8xi32> to vector<16x8xf32>
    %34 = arith.truncf %33 : vector<16x8xf32> to vector<16x8xbf16>
    %35 = tpu.iota {dimensions = array<i32: 0>} : vector<8x16xi32>
    %36 = vector.broadcast %8 : vector<1x16xi32> to vector<8x16xi32>
    %37 = arith.cmpi eq, %35, %36 : vector<8x16xi32>
    %38 = arith.extui %37 : vector<8x16xi1> to vector<8x16xi32>
    %39 = arith.sitofp %38 : vector<8x16xi32> to vector<8x16xf32>
    %40 = arith.truncf %39 : vector<8x16xf32> to vector<8x16xbf16>
    %41 = tpu.iota {dimensions = array<i32: 1>} : vector<8x2xi32>
    %42 = vector.broadcast %7 : vector<8x1xi32> to vector<8x2xi32>
    %43 = arith.cmpi eq, %41, %42 : vector<8x2xi32>
    %44 = arith.extui %43 : vector<8x2xi1> to vector<8x2xi32>
    %45 = arith.sitofp %44 : vector<8x2xi32> to vector<8x2xf32>
    %46 = arith.truncf %45 : vector<8x2xf32> to vector<8x2xbf16>
    %c0_19 = arith.constant 0 : index
    %c0_20 = arith.constant 0 : index
    %47 = vector.load %arg4[%c0_19, %c0_20] : memref<32x128xbf16, #tpu.memory_space<vmem>>, vector<32x128xbf16>
    %cst = arith.constant dense<0.000000e+00> : vector<8x128xf32>
    %48 = tpu.matmul %1, %47, %cst {dimension_numbers = #tpu.dot_dimension_numbers<[1], [0], [0], [1], [0, 0, 1, 1], [], []>} : vector<8x32xbf16>, vector<32x128xbf16>, vector<8x128xf32> -> vector<8x128xf32>
    %49 = vector.extract_strided_slice %48 {offsets = [0, 0], sizes = [8, 64], strides = [1, 1]} : vector<8x128xf32> to vector<8x64xf32>
    %50 = vector.extract_strided_slice %48 {offsets = [0, 64], sizes = [8, 64], strides = [1, 1]} : vector<8x128xf32> to vector<8x64xf32>
    %51 = arith.truncf %49 : vector<8x64xf32> to vector<8x64xbf16>
    %cst_21 = arith.constant dense<0.000000e+00> : vector<16x64xf32>
    %52 = tpu.matmul %34, %51, %cst_21 {dimension_numbers = #tpu.dot_dimension_numbers<[1], [0], [0], [1], [0, 0, 1, 1], [], []>} : vector<16x8xbf16>, vector<8x64xbf16>, vector<16x64xf32> -> vector<16x64xf32>
    %cst_22 = arith.constant dense<0.000000e+00> : vector<16x64xf32>
    %53 = tpu.matmul %3, %22, %cst_22 {dimension_numbers = #tpu.dot_dimension_numbers<[1], [0], [0], [1], [0, 0, 1, 1], [], []>} : vector<16x32xbf16>, vector<32x64xbf16>, vector<16x64xf32> -> vector<16x64xf32>
    %54 = arith.addf %52, %53 : vector<16x64xf32>
    %55 = vector.broadcast %10 : vector<1x64xf32> to vector<16x64xf32>
    %56 = arith.addf %54, %55 : vector<16x64xf32>
    %cst_23 = arith.constant 0.000000e+00 : f32
    %57 = vector.broadcast %cst_23 : f32 to vector<16x64xf32>
    %58 = arith.maximumf %56, %57 : vector<16x64xf32>
    %59 = arith.truncf %58 : vector<16x64xf32> to vector<16x64xbf16>
    %cst_24 = arith.constant dense<0.000000e+00> : vector<16x64xf32>
    %60 = tpu.matmul %59, %23, %cst_24 {dimension_numbers = #tpu.dot_dimension_numbers<[1], [0], [0], [1], [0, 0, 1, 1], [], []>} : vector<16x64xbf16>, vector<64x64xbf16>, vector<16x64xf32> -> vector<16x64xf32>
    %61 = vector.broadcast %11 : vector<1x64xf32> to vector<16x64xf32>
    %62 = arith.addf %60, %61 : vector<16x64xf32>
    %cst_25 = arith.constant 0.000000e+00 : f32
    %63 = vector.broadcast %cst_25 : f32 to vector<16x64xf32>
    %64 = arith.maximumf %62, %63 : vector<16x64xf32>
    %65 = arith.truncf %64 : vector<16x64xf32> to vector<16x64xbf16>
    %cst_26 = arith.constant dense<0.000000e+00> : vector<16x64xf32>
    %66 = tpu.matmul %65, %24, %cst_26 {dimension_numbers = #tpu.dot_dimension_numbers<[1], [0], [0], [1], [0, 0, 1, 1], [], []>} : vector<16x64xbf16>, vector<64x64xbf16>, vector<16x64xf32> -> vector<16x64xf32>
    %67 = vector.broadcast %12 : vector<1x64xf32> to vector<16x64xf32>
    %68 = arith.addf %66, %67 : vector<16x64xf32>
    %cst_27 = arith.constant 0.000000e+00 : f32
    %69 = vector.broadcast %cst_27 : f32 to vector<16x64xf32>
    %70 = arith.maximumf %68, %69 : vector<16x64xf32>
    %cst_28 = arith.constant dense<0.000000e+00> : vector<16xf32>
    %71 = vector.multi_reduction <add>, %70, %cst_28 [1] : vector<16x64xf32> to vector<16xf32>
    %72 = vector.shape_cast %71 : vector<16xf32> to vector<16x1xf32>
    %cst_29 = arith.constant 6.400000e+01 : f32
    %73 = vector.broadcast %cst_29 : f32 to vector<16x1xf32>
    %74 = arith.divf %72, %73 : vector<16x1xf32>
    %75 = vector.broadcast %74 : vector<16x1xf32> to vector<16x64xf32>
    %76 = arith.subf %70, %75 : vector<16x64xf32>
    %77 = arith.mulf %76, %76 : vector<16x64xf32>
    %cst_30 = arith.constant dense<0.000000e+00> : vector<16xf32>
    %78 = vector.multi_reduction <add>, %77, %cst_30 [1] : vector<16x64xf32> to vector<16xf32>
    %79 = vector.shape_cast %78 : vector<16xf32> to vector<16x1xf32>
    %cst_31 = arith.constant 6.400000e+01 : f32
    %80 = vector.broadcast %cst_31 : f32 to vector<16x1xf32>
    %81 = arith.divf %79, %80 : vector<16x1xf32>
    %82 = vector.broadcast %74 : vector<16x1xf32> to vector<16x64xf32>
    %83 = arith.subf %70, %82 : vector<16x64xf32>
    %cst_32 = arith.constant 9.99999974E-6 : f32
    %84 = vector.broadcast %cst_32 : f32 to vector<16x1xf32>
    %85 = arith.addf %81, %84 : vector<16x1xf32>
    %86 = math.rsqrt %85 : vector<16x1xf32>
    %87 = vector.broadcast %86 : vector<16x1xf32> to vector<16x64xf32>
    %88 = arith.mulf %83, %87 : vector<16x64xf32>
    %89 = vector.broadcast %13 : vector<1x64xf32> to vector<16x64xf32>
    %90 = arith.mulf %88, %89 : vector<16x64xf32>
    %91 = vector.broadcast %14 : vector<1x64xf32> to vector<16x64xf32>
    %92 = arith.addf %90, %91 : vector<16x64xf32>
    %93 = arith.truncf %92 : vector<16x64xf32> to vector<16x64xbf16>
    %c0_33 = arith.constant 0 : index
    %c0_34 = arith.constant 0 : index
    %94 = vector.load %arg6[%c0_33, %c0_34] : memref<64x64xbf16, #tpu.memory_space<vmem>>, vector<64x64xbf16>
    %cst_35 = arith.constant dense<0.000000e+00> : vector<16x64xf32>
    %95 = tpu.matmul %93, %94, %cst_35 {dimension_numbers = #tpu.dot_dimension_numbers<[1], [0], [0], [1], [0, 0, 1, 1], [], []>} : vector<16x64xbf16>, vector<64x64xbf16>, vector<16x64xf32> -> vector<16x64xf32>
    %96 = vector.extract_strided_slice %95 {offsets = [0, 0], sizes = [16, 32], strides = [1, 1]} : vector<16x64xf32> to vector<16x32xf32>
    %97 = vector.broadcast %20 : vector<1x32xf32> to vector<16x32xf32>
    %98 = arith.addf %96, %97 : vector<16x32xf32>
    %99 = arith.truncf %98 : vector<16x32xf32> to vector<16x32xbf16>
    %cst_36 = arith.constant dense<0.000000e+00> : vector<8x32xf32>
    %100 = tpu.matmul %40, %99, %cst_36 {dimension_numbers = #tpu.dot_dimension_numbers<[1], [0], [0], [1], [0, 0, 1, 1], [], []>} : vector<8x16xbf16>, vector<16x32xbf16>, vector<8x32xf32> -> vector<8x32xf32>
    %cst_37 = arith.constant dense<0.000000e+00> : vector<2x64xf32>
    %101 = tpu.matmul %5, %26, %cst_37 {dimension_numbers = #tpu.dot_dimension_numbers<[1], [0], [0], [1], [0, 0, 1, 1], [], []>} : vector<2x32xbf16>, vector<32x64xbf16>, vector<2x64xf32> -> vector<2x64xf32>
    %102 = arith.truncf %100 : vector<8x32xf32> to vector<8x32xbf16>
    %cst_38 = arith.constant dense<0.000000e+00> : vector<8x64xf32>
    %103 = tpu.matmul %102, %25, %cst_38 {dimension_numbers = #tpu.dot_dimension_numbers<[1], [0], [0], [1], [0, 0, 1, 1], [], []>} : vector<8x32xbf16>, vector<32x64xbf16>, vector<8x64xf32> -> vector<8x64xf32>
    %104 = arith.addf %50, %103 : vector<8x64xf32>
    %105 = arith.truncf %101 : vector<2x64xf32> to vector<2x64xbf16>
    %cst_39 = arith.constant dense<0.000000e+00> : vector<8x64xf32>
    %106 = tpu.matmul %46, %105, %cst_39 {dimension_numbers = #tpu.dot_dimension_numbers<[1], [0], [0], [1], [0, 0, 1, 1], [], []>} : vector<8x2xbf16>, vector<2x64xbf16>, vector<8x64xf32> -> vector<8x64xf32>
    %107 = arith.addf %104, %106 : vector<8x64xf32>
    %108 = vector.broadcast %15 : vector<1x64xf32> to vector<8x64xf32>
    %109 = arith.addf %107, %108 : vector<8x64xf32>
    %cst_40 = arith.constant 0.000000e+00 : f32
    %110 = vector.broadcast %cst_40 : f32 to vector<8x64xf32>
    %111 = arith.maximumf %109, %110 : vector<8x64xf32>
    %112 = arith.truncf %111 : vector<8x64xf32> to vector<8x64xbf16>
    %cst_41 = arith.constant dense<0.000000e+00> : vector<8x64xf32>
    %113 = tpu.matmul %112, %27, %cst_41 {dimension_numbers = #tpu.dot_dimension_numbers<[1], [0], [0], [1], [0, 0, 1, 1], [], []>} : vector<8x64xbf16>, vector<64x64xbf16>, vector<8x64xf32> -> vector<8x64xf32>
    %114 = vector.broadcast %16 : vector<1x64xf32> to vector<8x64xf32>
    %115 = arith.addf %113, %114 : vector<8x64xf32>
    %cst_42 = arith.constant 0.000000e+00 : f32
    %116 = vector.broadcast %cst_42 : f32 to vector<8x64xf32>
    %117 = arith.maximumf %115, %116 : vector<8x64xf32>
    %118 = arith.truncf %117 : vector<8x64xf32> to vector<8x64xbf16>
    %cst_43 = arith.constant dense<0.000000e+00> : vector<8x64xf32>
    %119 = tpu.matmul %118, %28, %cst_43 {dimension_numbers = #tpu.dot_dimension_numbers<[1], [0], [0], [1], [0, 0, 1, 1], [], []>} : vector<8x64xbf16>, vector<64x64xbf16>, vector<8x64xf32> -> vector<8x64xf32>
    %120 = vector.broadcast %17 : vector<1x64xf32> to vector<8x64xf32>
    %121 = arith.addf %119, %120 : vector<8x64xf32>
    %cst_44 = arith.constant 0.000000e+00 : f32
    %122 = vector.broadcast %cst_44 : f32 to vector<8x64xf32>
    %123 = arith.maximumf %121, %122 : vector<8x64xf32>
    %cst_45 = arith.constant dense<0.000000e+00> : vector<8xf32>
    %124 = vector.multi_reduction <add>, %123, %cst_45 [1] : vector<8x64xf32> to vector<8xf32>
    %125 = vector.shape_cast %124 : vector<8xf32> to vector<8x1xf32>
    %cst_46 = arith.constant 6.400000e+01 : f32
    %126 = vector.broadcast %cst_46 : f32 to vector<8x1xf32>
    %127 = arith.divf %125, %126 : vector<8x1xf32>
    %128 = vector.broadcast %127 : vector<8x1xf32> to vector<8x64xf32>
    %129 = arith.subf %123, %128 : vector<8x64xf32>
    %130 = arith.mulf %129, %129 : vector<8x64xf32>
    %cst_47 = arith.constant dense<0.000000e+00> : vector<8xf32>
    %131 = vector.multi_reduction <add>, %130, %cst_47 [1] : vector<8x64xf32> to vector<8xf32>
    %132 = vector.shape_cast %131 : vector<8xf32> to vector<8x1xf32>
    %cst_48 = arith.constant 6.400000e+01 : f32
    %133 = vector.broadcast %cst_48 : f32 to vector<8x1xf32>
    %134 = arith.divf %132, %133 : vector<8x1xf32>
    %135 = vector.broadcast %127 : vector<8x1xf32> to vector<8x64xf32>
    %136 = arith.subf %123, %135 : vector<8x64xf32>
    %cst_49 = arith.constant 9.99999974E-6 : f32
    %137 = vector.broadcast %cst_49 : f32 to vector<8x1xf32>
    %138 = arith.addf %134, %137 : vector<8x1xf32>
    %139 = math.rsqrt %138 : vector<8x1xf32>
    %140 = vector.broadcast %139 : vector<8x1xf32> to vector<8x64xf32>
    %141 = arith.mulf %136, %140 : vector<8x64xf32>
    %142 = vector.broadcast %18 : vector<1x64xf32> to vector<8x64xf32>
    %143 = arith.mulf %141, %142 : vector<8x64xf32>
    %144 = vector.broadcast %19 : vector<1x64xf32> to vector<8x64xf32>
    %145 = arith.addf %143, %144 : vector<8x64xf32>
    %146 = arith.truncf %145 : vector<8x64xf32> to vector<8x64xbf16>
    %c0_50 = arith.constant 0 : index
    %c0_51 = arith.constant 0 : index
    %147 = vector.load %arg6[%c0_50, %c0_51] : memref<64x64xbf16, #tpu.memory_space<vmem>>, vector<64x64xbf16>
    %cst_52 = arith.constant dense<0.000000e+00> : vector<8x64xf32>
    %148 = tpu.matmul %146, %147, %cst_52 {dimension_numbers = #tpu.dot_dimension_numbers<[1], [0], [0], [1], [0, 0, 1, 1], [], []>} : vector<8x64xbf16>, vector<64x64xbf16>, vector<8x64xf32> -> vector<8x64xf32>
    %149 = vector.extract_strided_slice %148 {offsets = [0, 32], sizes = [8, 32], strides = [1, 1]} : vector<8x64xf32> to vector<8x32xf32>
    %150 = vector.broadcast %21 : vector<1x32xf32> to vector<8x32xf32>
    %151 = arith.addf %149, %150 : vector<8x32xf32>
    %152 = arith.addf %0, %151 : vector<8x32xf32>
    %c0_53 = arith.constant 0 : index
    %c0_54 = arith.constant 0 : index
    %153 = vector.load %arg8[%c0_53, %c0_54] : memref<8x32xf32, #tpu.memory_space<vmem>>, vector<8x32xf32>
    tpu.vector_store %arg8[%c0_53, %c0_54], %152 {strides = array<i32>} : memref<8x32xf32, #tpu.memory_space<vmem>>, vector<8x32xf32>,
    return
  }
}

</mosaic_0001>

<bundles_post_ra>
// kernel: _node_model_forward.1
= control target key start
LH: loop header
LB: loop body
LE: loop exit
PB: predicated region body
PF: predicated region fallthrough
CT: control target
= control target key end

     0   :  { %13 = vsyncpa [#allocation3], 0  ;;  %s1687_s0 = inlined_call_operand.hbm [shape: f32[8,32], index: 0, kind: input, shape index: {}, may-alias: {0,8}]   ;;  %s1688_s1 = inlined_call_operand.vmem [shape: f32[16,32], index: 1, kind: input, shape index: {}]   ;;  %s1689_s2 = inlined_call_operand.vmem [shape: f32[2,32], index: 2, kind: input, shape index: {}]   ;;  %s1690_s3 = inlined_call_operand.vmem [shape: s32[17,16], index: 3, kind: input, shape index: {}]   ;;  %s1691_s4 = inlined_call_operand.vmem [shape: bf16[32,128], index: 4, kind: input, shape index: {}]   ;;  %s1692_s5 = inlined_call_operand.vmem [shape: bf16[352,64], index: 5, kind: input, shape index: {}]   ;;  %s1693_s6 = inlined_call_operand.vmem [shape: bf16[64,64], index: 6, kind: input, shape index: {}]   ;;  %s1694_s7 = inlined_call_operand.vmem [shape: f32[12,64], index: 7, kind: input, shape index: {}]   ;;  %s1695_s8 = inlined_call_operand.hbm [shape: f32[8,32], index: 8, kind: output, shape index: {}, may-alias: {0,8}]  }
   0x1   :  { %14 = vsyncpa [#allocation4], 0  ;;  %s1355_s27 = smov [#allocation2]  }
   0x2   :  { %s21_s28 = sshll.u32 %s1355_s27, 4  ;;  %s22_s28 = int_to_ptr.vmem [resolvable:$true] %s21_s28 }
   0x3   :  { %s1319_s29 = scalar_lea.vmem %s22_s28, 128  ;;  %p1324_p1 = scmp.lt.s32.totalorder %s22_s28, %s22_s28 }
   0x4   :  { %p1320_p0 = scmp.ne.s32.totalorder %s22_s28, %s1319_s29  ;;  %p1325_p2 = scmp.lt.s32.totalorder %s1319_s29, %s1319_s29 }
   0x6   :  { %p1326_p3 = por %p1325_p2, %p1324_p1 }
   0x8   :  { %p1327_p4 = pnand %p1326_p3, %p1320_p0 }
   0xa   :  { %1330 = shalt.err (!%p1327_p4)
}
   0xb   :  { %24 = dma.hbm_to_vmem [thread:$0]  %s1687_s0, 128, %s22_s28, [#allocation3]  }
   0xc   :  { %1351 = dma.done.wait [#allocation3], 128  }
   0xd   :  { %1352 = vsyncadd [#allocation3], 4294967168  ;;  %v1356_v0 = vmov 0.0   ;;  %vm1357_vm0 = vmmov 0   ;;  %v1358_v1 = vmov 0   ;;  %v1277_v2 = vld [vmem:[%s1691_s4 + $0x8] sm:$0xff]   ;;  %v99_v15 = vlaneseq }
   0xe   :  { %1143 = vmatprep.subr.bf16.mxu0 %v1356_v0  ;;  %1147 = vmatprep.mubr.msk.bf16.mxu0 %vm1357_vm0, %v1356_v0  ;;  %v1278_v3 = vld [vmem:[%s1691_s4] sm:$0xff]   ;;  %v51_v6 = vld [vmem:[%s1690_s3 + $0x8] sm:$0xff]  ;;  %vm147_vm1 = vcmask 261120   ;;  %vm252_vm4 = vcmask 1043456   ;;  %vm248_vm5 = vcmask 64512   ;;  %v1283_v32 = vld [vmem:[%s1692_s5 + $0x18] sm:$0xff]  }
   0xf   :  { %1274 = vset.pattern.permute.xlu0 %v1358_v1  ;;  %1151 = vmatprep.subr.bf16.mxu1 %v1356_v0  ;;  %v1424_v4 = vld [vmem:[#allocation2] sm:$0xff]  ;;  %v1279_v7 = vld [vmem:[%s1692_s5 + $0x8] sm:$0xff]   ;;  %v1463_v16 = vand.u32 127, %v99_v15  ;;  %v1284_v33 = vld [vmem:[%s1692_s5 + $0x10] sm:$0xff]   ;;  %v1492_v35 = vshrl.u32 %v99_v15, 7  ;;  %vm334_vm6 = vcmask 523264  }
  0x10   :  { %1155 = vmatprep.mubr.msk.bf16.mxu1 %vm1357_vm0, %v1356_v0  ;;  %1144 = vmatpush3.bf16.msra.mxu0 %v1277_v2  ;;  %v1429_v5 = vld [vmem:[%s1690_s3] sm:$0xff]  ;;  %v44_v9 = vpack.c.bf16 %v1424_v4, %v1424_v4  ;;  %v46_v11 = vld [vmem:[%s1688_s1 + $0x8] sm:$0xff]  ;;  %v1287_v51 = vld [vmem:[%s1692_s5 + $0x38] sm:$0xff]   ;;  %vm579_vm8 = vcmask 130048   ;;  %vm744_vm10 = vcmask 1040384   ;;  %vm740_vm11 = vcmask 15360  }
  0x11   :  { %1145 = vmatprep.subr.bf16.mxu0 %v1356_v0  ;;  %102 = vperm.xlu0 %1274, %v1429_v5   ;;  %v1280_v8 = vld [vmem:[%s1692_s5] sm:$0xff]   ;;  %v1281_v13 = vld [vmem:[%s1692_s5 + $0x28] sm:$0xff]   ;;  %v299_v36 = vsub.s32 0, %v1492_v35  ;;  %v1288_v52 = vld [vmem:[%s1692_s5 + $0x30] sm:$0xff]   ;;  %v308_v53 = vsub.s32 1, %v1492_v35  ;;  %v384_v1 = vsub.s32 2, %v1492_v35 }
  0x12   :  { %1152 = vmatpush3.bf16.msra.mxu1 %v1279_v7  ;;  %v45_v10 = vld [vmem:[%s1688_s1] sm:$0xff]  ;;  %v1285_v34 = vld [vmem:[%s1692_s5 + $0x48] sm:$0xff]   ;;  %s1362_s1 = smov 96   ;;  %s1363_s26 = smov [#allocation5]  }
  0x13   :  { %1153 = vmatprep.subr.bf16.mxu1 %v1356_v0  ;;  %v47_v12 = vpack.c.bf16 %v46_v11, %v45_v10  ;;  %v1282_v31 = vld [vmem:[%s1692_s5 + $0x20] sm:$0xff]   ;;  %s1040_s27 = sshll.u32 %s1363_s26, 4  ;;  %s1041_s27 = int_to_ptr.vmem [resolvable:$true] %s1040_s27 }
  0x14   :  { %1146 = vmatpush3.bf16.msra.mxu0 %v1278_v3  ;;  %v1498_v37 = vld [vmem:[%s1694_s7] sm:$0xff]  ;;  %s1331_s28 = scalar_lea.vmem %s1041_s27, 128  ;;  %p1336_p6 = scmp.lt.s32.totalorder %s1041_s27, %s1041_s27 }
  0x15   :  { %105 = vperm.xlu0 %1274, %v51_v6   ;;  %1159 = vmatprep.subr.bf16.mxu0 %v1356_v0  ;;  %v300_v40 = vrot.slane %v1498_v37, %v299_v36  ;;  %v1286_v50 = vld [vmem:[%s1692_s5 + $0x40] sm:$0xff]   ;;  %v309_v54 = vrot.slane %v1498_v37, %v308_v53  ;;  %v385_v2 = vrot.slane %v1498_v37, %v384_v1  ;;  %p1332_p5 = scmp.ne.s32.totalorder %s1041_s27, %s1331_s28  ;;  %p1337_p7 = scmp.lt.s32.totalorder %s1331_s28, %s1331_s28 }
  0x16   :  { %1154 = vmatpush3.bf16.msra.mxu1 %v1280_v8 }
  0x17   :  { %1148 = vmatmul.mubr.msk.bf16.vlgmr.msra.gmra.mxu0 %vm147_vm1, %v44_v9  ;;  %1165 = vmatprep.subr.bf16.mxu1 %v1356_v0  ;;  %p1338_p8 = por %p1337_p7, %p1336_p6 }
  0x18   :  { %1161 = vmatprep.mubr.msk.bf16.mxu0 %vm1357_vm0, %v1356_v0 }
  0x19   :  { %1156 = vmatmul.mubr.msk.bf16.vlgmr.msra.gmra.mxu1 %vm147_vm1, %v47_v12  ;;  %p1339_p9 = pnand %p1338_p8, %p1332_p5 }
  0x1a   :  { %1173 = vmatprep.mubr.msk.bf16.mxu1 %vm1357_vm0, %v1356_v0  ;;  %1166 = vmatpush3.bf16.msra.mxu1 %v1281_v13 }
  0x1b   :  { %1167 = vmatprep.subr.bf16.mxu1 %v1356_v0 }
  0x1e   :  { %1168 = vmatpush3.bf16.msra.mxu1 %v1282_v31 }
  0x1f   :  { %1169 = vmatprep.subr.bf16.mxu1 %v1356_v0 }
  0x22   :  { %1170 = vmatpush3.bf16.msra.mxu1 %v1283_v32 }
  0x23   :  { %1171 = vmatprep.subr.bf16.mxu1 %v1356_v0 }
  0x26   :  { %1172 = vmatpush3.bf16.msra.mxu1 %v1284_v33 }
  0x27   :  { %1189 = vmatprep.subr.bf16.mxu1 %v1356_v0 }
  0x8c   :  { %v103_v14 = vpop.permute.xlu0 %102 }
  0x8d   :  { %vm107_vm2 = vcmp.eq.s32.totalorder %v1463_v16, %v103_v14 }
  0x8e   :  { %v1049_v20 = vsel %vm107_vm2, 1.0, %v1356_v0 }
  0x90   :  { %v106_v17 = vpop.permute.xlu0 %105 }
  0x91   :  { %vm108_vm3 = vcmp.eq.s32.totalorder %v1463_v16, %v106_v17 }
  0x92   :  { %v1050_v21 = vsel %vm108_vm3, 1.0, %v1356_v0 }
  0x93   :  { %v113_v25 = vpack.c.bf16 %v1050_v21, %v1049_v20 }
  0xd7   :  { %v1467_v18 = vpop.f32.mrf.mxu0 }
  0xd8   :  { %v191_v19 = vpack.c.bf16 %v1467_v18, %v1467_v18 }
  0xd9   :  { %v1149_v22 = vpop.f32.mrf.mxu0  ;;  %v241_v27 = vpop.f32.mrf.mxu1 }
  0xda   :  { %v254_v23 = vsel %vm252_vm4, %v191_v19, 0 }
  0xdb   :  { %v188_v24 = vpop.f32.mrf.mxu0  ;;  %1160 = vmatpush3.bf16.msra.mxu0 %v254_v23  ;;  %v1157_v28 = vpop.f32.mrf.mxu1 }
  0xdc   :  { %1177 = vmatprep.subr.bf16.mxu0 %v1356_v0  ;;  %v1543_v28 = vld [vmem:[%s1693_s6 + $0x10] sm:$0xff]  }
  0xdd   :  { %v1150_v26 = vpop.f32.mrf.mxu0  ;;  %v244_v29 = vpop.f32.mrf.mxu1 }
  0xde   :  { %1162 = vmatmul.mubr.msk.bf16.vlgmr.msra.gmra.mxu0 %vm248_vm5, %v113_v25 }
  0xdf   :  { %1185 = vmatprep.mubr.msk.bf16.mxu0 %vm1357_vm0, %v1356_v0  ;;  %v1158_v30 = vpop.f32.mrf.mxu1  ;;  %1178 = vmatpush3.bf16.msra.mxu0 %v1285_v34 }
  0xe0   :  { %1179 = vmatprep.subr.bf16.mxu0 %v1356_v0  ;;  %v1556_v30 = vld [vmem:[%s1693_s6] sm:$0xff]  }
  0xe3   :  { %1180 = vmatpush3.bf16.msra.mxu0 %v1286_v50 }
  0xe4   :  { %1181 = vmatprep.subr.bf16.mxu0 %v1356_v0 }
  0xe7   :  { %1182 = vmatpush3.bf16.msra.mxu0 %v1287_v51 }
  0xe8   :  { %1183 = vmatprep.subr.bf16.mxu0 %v1356_v0 }
  0xeb   :  { %1184 = vmatpush3.bf16.msra.mxu0 %v1288_v52 }
  0xec   :  { %1201 = vmatprep.subr.bf16.mxu0 %v1356_v0 }
 0x19e   :  { %v290_v38 = vpop.f32.mrf.mxu0 }
 0x19f   :  { %v291_v39 = vadd.f32 %v290_v38, %v241_v27  ;;  %v1536_v27 = vld [vmem:[%s1693_s6 + $0x18] sm:$0xff]  }
 0x1a0   :  { %v1163_v41 = vpop.f32.mrf.mxu0 }
 0x1a1   :  { %v301_v43 = vadd.f32 %v300_v40, %v291_v39 }
 0x1a2   :  { %v293_v42 = vpop.f32.mrf.mxu0 }
 0x1a3   :  { %v294_v44 = vadd.f32 %v293_v42, %v244_v29  ;;  %v303_v47 = vmax.f32 %v301_v43, 0.0  ;;  %v1550_v29 = vld [vmem:[%s1693_s6 + $0x8] sm:$0xff]  }
 0x1a4   :  { %v1164_v45 = vpop.f32.mrf.mxu0 }
 0x1a5   :  { %v302_v46 = vadd.f32 %v300_v40, %v294_v44  ;;  %v485_v40 = vsub.s32 3, %v1492_v35  ;;  %v491_v44 = vsub.s32 4, %v1492_v35 }
 0x1a7   :  { %v304_v48 = vmax.f32 %v302_v46, 0.0  ;;  %v486_v43 = vrot.slane %v1498_v37, %v485_v40 }
 0x1a9   :  { %v305_v49 = vpack.c.bf16 %v304_v48, %v303_v47  ;;  %v492_v48 = vrot.slane %v1498_v37, %v491_v44 }
 0x1ab   :  { %1174 = vmatmul.mubr.msk.bf16.vlgmr.msra.gmra.mxu1 %vm334_vm6, %v305_v49 }
 0x1ac   :  { %1197 = vmatprep.mubr.msk.bf16.mxu1 %vm1357_vm0, %v1356_v0  ;;  %1190 = vmatpush3.bf16.msra.mxu1 %v1536_v27 }
 0x1ad   :  { %1191 = vmatprep.subr.bf16.mxu1 %v1356_v0 }
 0x1b0   :  { %1192 = vmatpush3.bf16.msra.mxu1 %v1543_v28 }
 0x1b1   :  { %1193 = vmatprep.subr.bf16.mxu1 %v1356_v0 }
 0x1b4   :  { %1194 = vmatpush3.bf16.msra.mxu1 %v1550_v29 }
 0x1b5   :  { %1195 = vmatprep.subr.bf16.mxu1 %v1356_v0 }
 0x1b8   :  { %1196 = vmatpush3.bf16.msra.mxu1 %v1556_v30 }
 0x1b9   :  { %1215 = vmatprep.subr.bf16.mxu1 %v1356_v0 }
 0x26b   :  { %v372_v55 = vpop.f32.mrf.mxu1 }
 0x26c   :  { %v373_v57 = vadd.f32 %v372_v55, %v309_v54  ;;  %v1359_v55 = vmov 1  }
 0x26d   :  { %v1175_v56 = vpop.f32.mrf.mxu1  ;;  %1275 = vset.pattern.permute.xlu1 %v1359_v55  ;;  %1276 = vset.pattern.permute.xlu0 %v1359_v55 }
 0x26e   :  { %v379_v61 = vmax.f32 %v373_v57, 0.0  ;;  %v1578_v56 = vld [vmem:[%s1694_s7 + $0x8] sm:$0xf]  ;;  %v1051_v57 = vld [vmem:[%s1690_s3 + $0x10] ss:$0 sm:$0xff] }
 0x26f   :  { %v375_v58 = vpop.f32.mrf.mxu1  ;;  %vm120_vm7 = vcmp.eq.s32.totalorder %v1492_v35, %v1051_v57 }
 0x270   :  { %v376_v59 = vadd.f32 %v375_v58, %v309_v54  ;;  %v1295_v54 = vld [vmem:[%s1692_s5 + $0x58] sm:$0xff]  }
 0x271   :  { %v1176_v60 = vpop.f32.mrf.mxu1 }
 0x272   :  { %v380_v62 = vmax.f32 %v376_v59, 0.0  ;;  %v575_v59 = vrot.slane %v1578_v56, %v384_v1  ;;  %v1294_v1 = vld [vmem:[%s1692_s5 + $0x60] sm:$0xff]  }
 0x274   :  { %v381_v63 = vpack.c.bf16 %v380_v62, %v379_v61 }
 0x276   :  { %1186 = vmatmul.mubr.msk.bf16.vlgmr.msra.gmra.mxu0 %vm334_vm6, %v381_v63  ;;  %v1052_v63 = vsel %vm120_vm7, 1.0, %v1356_v0 }
 0x277   :  { %1203 = vmatprep.mubr.msk.bf16.mxu0 %vm1357_vm0, %v1356_v0 }
 0x336   :  { %v447_v3 = vpop.f32.mrf.mxu0 }
 0x337   :  { %v448_v6 = vadd.f32 %v447_v3, %v385_v2 }
 0x338   :  { %v1187_v7 = vpop.f32.mrf.mxu0 }
 0x339   :  { %v454_v8 = vmax.f32 %v448_v6, 0.0  ;;  %v123_v6 = vpack.c.bf16 %v1052_v63, %v1052_v63  ;;  %v1293_v7 = vld [vmem:[%s1692_s5 + $0x68] sm:$0xff]  }
 0x33a   :  { %v450_v9 = vpop.f32.mrf.mxu0 }
 0x33b   :  { %v451_v10 = vadd.f32 %v450_v9, %v385_v2  ;;  %v456_v11 = vsel %vm334_vm6, %v454_v8, 0.0 }
 0x33c   :  { %457 = vadd.xlane.f32.xlu1 %v456_v11  ;;  %v1188_v12 = vpop.f32.mrf.mxu0 }
 0x33d   :  { %v455_v13 = vmax.f32 %v451_v10, 0.0  ;;  %v1296_v10 = vld [vmem:[%s1692_s5 + $0x50] sm:$0xff]  }
 0x33f   :  { %v459_v14 = vsel %vm334_vm6, %v455_v13, 0.0 }
 0x340   :  { %460 = vadd.xlane.f32.xlu1 %v459_v14 }
 0x3c5   :  { %v458_v15 = vpop.xlane.xlu1 %457 }
 0x3c6   :  { %v463_v17 = vmul.f32 0.015625, %v458_v15 }
 0x3c8   :  { %v465_v19 = vsub.f32 %v454_v8, %v463_v17  ;;  %v48_v8 = vld [vmem:[%s1689_s2] sm:$0x3]  ;;  %s1360_s2 = smov 64  }
 0x3c9   :  { %v461_v20 = vpop.xlane.xlu1 %460  ;;  %v49_v9 = vpack.c.bf16 %v48_v8, %v48_v8 }
 0x3ca   :  { %v464_v21 = vmul.f32 0.015625, %v461_v20  ;;  %v467_v22 = vmul.f32 %v465_v19, %v465_v19 }
 0x3cc   :  { %v466_v23 = vsub.f32 %v455_v13, %v464_v21  ;;  %v469_v24 = vsel %vm334_vm6, %v467_v22, 0.0 }
 0x3cd   :  { %470 = vadd.xlane.f32.xlu0 %v469_v24 }
 0x3ce   :  { %v468_v25 = vmul.f32 %v466_v23, %v466_v23 }
 0x3d0   :  { %v472_v26 = vsel %vm334_vm6, %v468_v25, 0.0 }
 0x3d1   :  { %473 = vadd.xlane.f32.xlu1 %v472_v26 }
 0x3e2   :  { %125 = vperm.xlu1 %1275, %v1429_v5  }
 0x456   :  { %v471_v31 = vpop.xlane.xlu0 %470 }
 0x457   :  { %v475_v32 = vmul.f32 0.015625, %v471_v31 }
 0x459   :  { %v477_v33 = vadd.f32 1e-05, %v475_v32 }
 0x45a   :  { %v474_v34 = vpop.xlane.xlu1 %473 }
 0x45b   :  { %1305 = vrsqrt.f32 %v477_v33  ;;  %v476_v38 = vmul.f32 0.015625, %v474_v34  ;;  %v795_v34 = vsub.s32 5, %v1492_v35 }
 0x45d   :  { %v478_v39 = vadd.f32 1e-05, %v476_v38  ;;  %v1297_v38 = vld [vmem:[%s1692_s5 + $0x88] sm:$0xff]  }
 0x45e   :  { %v126_v14 = vpop.permute.xlu1 %125 }
 0x45f   :  { %1307 = vrsqrt.f32 %v478_v39  ;;  %vm127_vm9 = vcmp.eq.s32.totalorder %v1463_v16, %v126_v14 }
 0x460   :  { %v1053_v20 = vsel %vm127_vm9, 1.0, %v1356_v0 }
 0x461   :  { %v130_v24 = vpack.c.bf16 %v1053_v20, %v1053_v20 }
 0x468   :  { %v1306_v41 = vpop.eup %1305 }
 0x469   :  { %v481_v42 = vmul.f32 %v1306_v41, %v465_v19  ;;  %v1298_v41 = vld [vmem:[%s1692_s5 + $0x80] sm:$0xff]  }
 0x46b   :  { %v487_v47 = vmul.f32 %v486_v43, %v481_v42  ;;  %v796_v42 = vrot.slane %v1498_v37, %v795_v34 }
 0x46c   :  { %v1308_v45 = vpop.eup %1307 }
 0x46d   :  { %v482_v46 = vmul.f32 %v1308_v45, %v466_v23  ;;  %v493_v50 = vadd.f32 %v492_v48, %v487_v47  ;;  %v1299_v45 = vld [vmem:[%s1692_s5 + $0x78] sm:$0xff]   ;;  %v1300_v47 = vld [vmem:[%s1692_s5 + $0x70] sm:$0xff]  }
 0x46f   :  { %v488_v49 = vmul.f32 %v486_v43, %v482_v46 }
 0x471   :  { %v494_v51 = vadd.f32 %v492_v48, %v488_v49  ;;  %v1301_v49 = vld [vmem:[%s1692_s5 + $0xa8] sm:$0xff]  }
 0x473   :  { %v495_v52 = vpack.c.bf16 %v494_v51, %v493_v50  ;;  %v1302_v51 = vld [vmem:[%s1692_s5 + $0xa0] sm:$0xff]  }
 0x475   :  { %1198 = vmatmul.mubr.msk.bf16.vlgmr.msra.gmra.mxu1 %vm334_vm6, %v495_v52 }
 0x476   :  { %1219 = vmatprep.mubr.msk.bf16.mxu1 %vm1357_vm0, %v1356_v0  ;;  %1216 = vmatpush3.bf16.msra.mxu1 %v1295_v54 }
 0x477   :  { %1217 = vmatprep.subr.bf16.mxu1 %v1356_v0 }
 0x47a   :  { %1218 = vmatpush3.bf16.msra.mxu1 %v1296_v10 }
 0x47b   :  { %1229 = vmatprep.subr.bf16.mxu1 %v1356_v0 }
 0x535   :  { %v565_v58 = vpop.f32.mrf.mxu1 }
 0x536   :  { %v576_v61 = vadd.f32 %v575_v59, %v565_v58 }
 0x537   :  { %v1199_v60 = vpop.f32.mrf.mxu1 }
 0x539   :  { %v568_v5 = vpop.f32.mrf.mxu1 }
 0x53a   :  { %v577_v62 = vadd.f32 %v575_v59, %v568_v5 }
 0x53b   :  { %v1200_v2 = vpop.f32.mrf.mxu1 }
 0x53c   :  { %v578_v3 = vpack.c.bf16 %v577_v62, %v576_v61 }
 0x53e   :  { %1202 = vmatpush3.bf16.msra.mxu0 %v578_v3 }
 0x53f   :  { %1207 = vmatprep.subr.bf16.mxu0 %v1356_v0 }
 0x541   :  { %1204 = vmatmul.mubr.msk.bf16.vlgmr.msra.gmra.mxu0 %vm579_vm8, %v123_v6 }
 0x542   :  { %1208 = vmatpush3.bf16.msra.mxu0 %v1293_v7  ;;  %1211 = vmatprep.mubr.msk.bf16.mxu0 %vm1357_vm0, %v1356_v0 }
 0x543   :  { %1209 = vmatprep.subr.bf16.mxu0 %v1356_v0 }
 0x546   :  { %1210 = vmatpush3.bf16.msra.mxu0 %v1294_v1 }
 0x547   :  { %1223 = vmatprep.subr.bf16.mxu0 %v1356_v0 }
 0x549   :  { %1212 = vmatmul.mubr.msk.bf16.vlgmr.msra.gmra.mxu0 %vm147_vm1, %v49_v9 }
 0x54a   :  { %1225 = vmatprep.mubr.msk.bf16.mxu0 %vm1357_vm0, %v1356_v0 }
 0x601   :  { %v617_v11 = vpop.f32.mrf.mxu0 }
 0x602   :  { %v678_v12 = vpack.c.bf16 %v617_v11, %v617_v11 }
 0x603   :  { %v1205_v13 = vpop.f32.mrf.mxu0 }
 0x604   :  { %1220 = vmatmul.mubr.msk.bf16.vlgmr.msra.gmra.mxu1 %vm147_vm1, %v678_v12 }
 0x605   :  { %v620_v15 = vpop.f32.mrf.mxu0  ;;  %1237 = vmatprep.mubr.msk.bf16.mxu1 %vm1357_vm0, %v1356_v0  ;;  %1230 = vmatpush3.bf16.msra.mxu1 %v1297_v38 }
 0x606   :  { %1231 = vmatprep.subr.bf16.mxu1 %v1356_v0 }
 0x607   :  { %v1206_v17 = vpop.f32.mrf.mxu0 }
 0x609   :  { %v672_v19 = vpop.f32.mrf.mxu0  ;;  %1232 = vmatpush3.bf16.msra.mxu1 %v1298_v41 }
 0x60a   :  { %v739_v21 = vpack.c.bf16 %v672_v19, %v672_v19  ;;  %1233 = vmatprep.subr.bf16.mxu1 %v1356_v0 }
 0x60b   :  { %v1213_v22 = vpop.f32.mrf.mxu0 }
 0x60c   :  { %v746_v23 = vsel %vm744_vm10, %v739_v21, 0 }
 0x60d   :  { %v675_v25 = vpop.f32.mrf.mxu0  ;;  %1224 = vmatpush3.bf16.msra.mxu0 %v746_v23  ;;  %1234 = vmatpush3.bf16.msra.mxu1 %v1299_v45  ;;  %v968_v23 = vrot.slane %v1578_v56, %v299_v36 }
 0x60e   :  { %1241 = vmatprep.subr.bf16.mxu0 %v1356_v0  ;;  %1235 = vmatprep.subr.bf16.mxu1 %v1356_v0  ;;  %v973_v25 = vrot.slane %v1578_v56, %v308_v53 }
 0x60f   :  { %v1214_v26 = vpop.f32.mrf.mxu0 }
 0x610   :  { %1226 = vmatmul.mubr.msk.bf16.vlgmr.msra.gmra.mxu0 %vm740_vm11, %v130_v24 }
 0x611   :  { %1249 = vmatprep.mubr.msk.bf16.mxu0 %vm1357_vm0, %v1356_v0  ;;  %1236 = vmatpush3.bf16.msra.mxu1 %v1300_v47 }
 0x612   :  { %1253 = vmatprep.subr.bf16.mxu1 %v1356_v0  ;;  %1242 = vmatpush3.bf16.msra.mxu0 %v1301_v49 }
 0x613   :  { %1243 = vmatprep.subr.bf16.mxu0 %v1356_v0 }
 0x616   :  { %1244 = vmatpush3.bf16.msra.mxu0 %v1302_v51 }
 0x617   :  { %1245 = vmatprep.subr.bf16.mxu0 %v1356_v0 }
 0x6c4   :  { %v728_v16 = vpop.f32.mrf.mxu1 }
 0x6c5   :  { %735 = vrot.lane.b32.xlu1 %v728_v16, %s1360_s2 }
 0x6c6   :  { %v1221_v31 = vpop.f32.mrf.mxu1 }
 0x6c8   :  { %v731_v32 = vpop.f32.mrf.mxu1 }
 0x6ca   :  { %v1222_v33 = vpop.f32.mrf.mxu1 }
 0x6d0   :  { %v782_v39 = vpop.f32.mrf.mxu0 }
 0x6d1   :  { %789 = vrot.lane.b32.xlu1 %v782_v39, %s1360_s2 }
 0x6d2   :  { %v1227_v43 = vpop.f32.mrf.mxu0 }
 0x6d4   :  { %v785_v44 = vpop.f32.mrf.mxu0 }
 0x6d5   :  { %798 = vrot.lane.b32.xlu1 %v796_v42, %s1360_s2 }
 0x6d6   :  { %v1228_v46 = vpop.f32.mrf.mxu0 }
 0x737   :  { %v736_v48 = vpop.permute.xlu1 %735 }
 0x738   :  { %v738_v52 = vadd.f32 %v736_v48, %v1467_v18  ;;  %v1303_v18 = vld [vmem:[%s1692_s5 + $0x98] sm:$0xff]  }
 0x739   :  { %1246 = vmatpush3.bf16.msra.mxu0 %v1303_v18 }
 0x73a   :  { %1247 = vmatprep.subr.bf16.mxu0 %v1356_v0 }
 0x743   :  { %v790_v50 = vpop.permute.xlu1 %789 }
 0x744   :  { %v792_v54 = vadd.f32 %v790_v50, %v738_v52 }
 0x747   :  { %v799_v55 = vpop.permute.xlu1 %798 }
 0x748   :  { %v801_v57 = vadd.f32 %v799_v55, %v792_v54 }
 0x74a   :  { %v802_v58 = vmax.f32 %v801_v57, 0.0 }
 0x74c   :  { %v803_v59 = vpack.c.bf16 %v802_v58, %v802_v58 }
 0x74e   :  { %809 = vrot.lane.b32.xlu0 %v803_v59, %s1360_s2 }
 0x7c0   :  { %v810_v60 = vpop.permute.xlu0 %809 }
 0x7c1   :  { %1238 = vmatmul.mubr.msk.bf16.vlgmr.msra.gmra.mxu1 %vm334_vm6, %v810_v60 }
 0x7c2   :  { %1254 = vmatpush3.bf16.msra.mxu1 %v1536_v27  ;;  %1261 = vmatprep.mubr.msk.bf16.mxu1 %vm1357_vm0, %v1356_v0  ;;  %v1304_v27 = vld [vmem:[%s1692_s5 + $0x90] sm:$0xff]   ;;  %s1361_s5 = smov 32  }
 0x7c3   :  { %1255 = vmatprep.subr.bf16.mxu1 %v1356_v0  ;;  %1248 = vmatpush3.bf16.msra.mxu0 %v1304_v27 }
 0x7c6   :  { %1256 = vmatpush3.bf16.msra.mxu1 %v1543_v28  ;;  %v806_v28 = vsub.s32 6, %v1492_v35 }
 0x7c7   :  { %1257 = vmatprep.subr.bf16.mxu1 %v1356_v0 }
 0x7ca   :  { %1258 = vmatpush3.bf16.msra.mxu1 %v1550_v29  ;;  %v807_v29 = vrot.slane %v1498_v37, %v806_v28 }
 0x7cb   :  { %1259 = vmatprep.subr.bf16.mxu1 %v1356_v0  ;;  %v882_v0 = vsub.s32 7, %v1492_v35 }
 0x7cd   :  { %v883_v6 = vrot.slane %v1498_v37, %v882_v0  ;;  %v1022_v37 = vrot.slane %v1578_v56, %v485_v40 }
 0x7ce   :  { %1260 = vmatpush3.bf16.msra.mxu1 %v1556_v30 }
 0x881   :  { %v872_v5 = vpop.f32.mrf.mxu1 }
 0x882   :  { %v873_v61 = vadd.f32 %v872_v5, %v807_v29 }
 0x883   :  { %v1239_v62 = vpop.f32.mrf.mxu1 }
 0x884   :  { %v878_v30 = vmax.f32 %v873_v61, 0.0 }
 0x885   :  { %v875_v63 = vpop.f32.mrf.mxu1 }
 0x886   :  { %v879_v2 = vpack.c.bf16 %v878_v30, %v878_v30 }
 0x887   :  { %v1240_v3 = vpop.f32.mrf.mxu1 }
 0x888   :  { %1250 = vmatmul.mubr.msk.bf16.vlgmr.msra.gmra.mxu0 %vm334_vm6, %v879_v2 }
 0x948   :  { %v945_v7 = vpop.f32.mrf.mxu0 }
 0x949   :  { %v946_v1 = vadd.f32 %v945_v7, %v883_v6 }
 0x94a   :  { %v1251_v8 = vpop.f32.mrf.mxu0 }
 0x94b   :  { %v951_v9 = vmax.f32 %v946_v1, 0.0 }
 0x94c   :  { %v948_v10 = vpop.f32.mrf.mxu0 }
 0x94d   :  { %v952_v11 = vsel %vm334_vm6, %v951_v9, 0.0 }
 0x94e   :  { %953 = vadd.xlane.f32.xlu1 %v952_v11  ;;  %v1252_v12 = vpop.f32.mrf.mxu0 }
 0x95f   :  { %1024 = vrot.lane.b32.xlu1 %v1022_v37, %s1361_s5 }
 0x9d7   :  { %v954_v13 = vpop.xlane.xlu1 %953 }
 0x9d8   :  { %v955_v14 = vmul.f32 0.015625, %v954_v13 }
 0x9da   :  { %v956_v15 = vsub.f32 %v951_v9, %v955_v14 }
 0x9db   :  { %v1025_v40 = vpop.permute.xlu1 %1024 }
 0x9dc   :  { %v957_v17 = vmul.f32 %v956_v15, %v956_v15 }
 0x9de   :  { %v958_v19 = vsel %vm334_vm6, %v957_v17, 0.0 }
 0x9df   :  { %959 = vadd.xlane.f32.xlu0 %v958_v19 }
 0xa68   :  { %v960_v20 = vpop.xlane.xlu0 %959 }
 0xa69   :  { %v961_v21 = vmul.f32 0.015625, %v960_v20 }
 0xa6b   :  { %v962_v22 = vadd.f32 1e-05, %v961_v21 }
 0xa6d   :  { %1309 = vrsqrt.f32 %v962_v22 }
 0xa7a   :  { %v1310_v24 = vpop.eup %1309 }
 0xa7b   :  { %v964_v26 = vmul.f32 %v1310_v24, %v956_v15 }
 0xa7d   :  { %v969_v16 = vmul.f32 %v968_v23, %v964_v26 }
 0xa7f   :  { %v974_v31 = vadd.f32 %v973_v25, %v969_v16 }
 0xa81   :  { %v975_v32 = vpack.c.bf16 %v974_v31, %v974_v31 }
 0xa83   :  { %1262 = vmatmul.mubr.msk.bf16.vlgmr.msra.gmra.mxu1 %vm334_vm6, %v975_v32 }
 0xb43   :  { %v1013_v33 = vpop.f32.mrf.mxu1 }
 0xb44   :  { %v1027_v34 = vadd.f32 %v1025_v40, %v1013_v33 }
 0xb45   :  { %v1263_v38 = vpop.f32.mrf.mxu1 }
 0xb46   :  { %1029 = vrot.lane.b32.xlu0 %v1027_v34, %s1362_s1 }
 0xb47   :  { %v1016_v39 = vpop.f32.mrf.mxu1 }
 0xb49   :  { %v1264_v41 = vpop.f32.mrf.mxu1 }
 0xbb8   :  { %v1030_v36 = vpop.permute.xlu0 %1029 }
 0xbb9   :  { %v1032_v35 = vadd.f32 %v1030_v36, %v1424_v4 }
 0xbbb   :  { %1033 = vst.msk [vmem:[#allocation5] sm:$0xff] %vm147_vm1, %v1032_v35 }
 0xbbc   :  { %1342 = shalt.err (!%p1339_p9)
}
 0xbbd   :  { %1043 = dma.vmem_to_hbm [thread:$0]  %s1041_s27, 128, %s1695_s8, [#allocation4]  }
 0xbbe   :  { %1353 = dma.done.wait [#allocation4], 128  }
 0xbbf   :  { %1354 = vsyncadd [#allocation4], 4294967168 }
 0xbc0   :  { %1047 = vsyncpa [#allocation3], 1 }
 0xbc1   :  { %1048 = vsyncpa [#allocation4], 1 }

</bundles_post_ra>
